<compile_context>
chip_gen: v7x
topology: tpu7x:2x2x1
jax: 0.10.0
libtpu: 0.0.40
codegen_flags: <defaults>
</compile_context>

<pallas_src>
import jax
import jax.numpy as jnp
from jax import lax
from jax.experimental import pallas as pl
from jax.experimental.pallas import tpu as pltpu

_LANE = 128          # lanes per vreg
_MAX_GROUPS = 32     # max statically-unrolled width-lane groups per grid step
_LOCAL_ELEMS = 8192  # target rows_s*width so local accumulators stay in vregs


def _pick_rows_per_sample(n, d):
    """Rows each sample is split into (free reshape; must divide d)."""
    for cand in (16, 8, 4, 2):
        if d % cand != 0:
            continue
        if d // cand < _LANE:      # keep >= one full lane register per row
            continue
        if n * cand > 64:          # keep total rows modest (register locals)
            continue
        return cand
    return 1


def _make_kernel(gpc, width, rows_s, chunk, d_row, out_lanes, needs_mask):
    folds = max(1, width // out_lanes)

    def kernel(pred_ref, target_ref, out_ref, inter_acc, s12_acc):
        k = pl.program_id(1)

        @pl.when(k == 0)
        def _():
            inter_acc[...] = jnp.zeros_like(inter_acc)
            s12_acc[...] = jnp.zeros_like(s12_acc)

        if needs_mask:
            lane = lax.broadcasted_iota(jnp.int32, (rows_s, width), 1)
            base = k * chunk

        # Register-resident local accumulators; VMEM scratch is touched only
        # once per grid step (after the group loop).
        inter_loc = jnp.zeros((rows_s, width), jnp.float32)
        s12_loc = jnp.zeros((rows_s, width), jnp.float32)
        for g in range(gpc):
            lo = g * width
            x = pred_ref[:, lo:lo + width].astype(jnp.float32)
            t = target_ref[:, lo:lo + width].astype(jnp.float32)
            p = 0.5 * jnp.tanh(0.5 * x) + 0.5   # sigmoid, 1 EUP op per element
            if needs_mask:
                valid = lane < (d_row - (base + lo))
                p = jnp.where(valid, p, 0.0)
                t = jnp.where(valid, t, 0.0)
            inter_loc = inter_loc + p * t
            s12_loc = s12_loc + (p + t)

        # Fold locals to 128 lanes with VPU adds, then one small scratch RMW.
        inter_f = inter_loc[:, :out_lanes]
        s12_f = s12_loc[:, :out_lanes]
        for j in range(1, folds):
            inter_f = inter_f + inter_loc[:, j * out_lanes:(j + 1) * out_lanes]
            s12_f = s12_f + s12_loc[:, j * out_lanes:(j + 1) * out_lanes]
        inter_acc[...] += inter_f
        s12_acc[...] += s12_f

        # Lane-dense epilogue store; per-sample reduction finishes in XLA.
        @pl.when(k == pl.num_programs(1) - 1)
        def _():
            out_ref[0] = inter_acc[...]
            out_ref[1] = s12_acc[...]

    return kernel


def _soft_dice_loss_impl(pred, target):
    n = pred.shape[0]
    pred2 = pred.reshape(n, -1)
    target2 = target.reshape(n, -1)
    d = pred2.shape[1]

    r = _pick_rows_per_sample(n, d)
    rows = n * r
    d_row = d // r
    # Free, contiguous reshapes -- no padding, no extra HBM traffic.
    pred2 = pred2.reshape(rows, d_row)
    target2 = target2.reshape(rows, d_row)

    # Minimum legal sublane multiple for a non-full block, given input dtypes.
    min_sub = 32 // min(pred2.dtype.itemsize, target2.dtype.itemsize, 4)
    # Split samples across the two TensorCores (v7x) whenever the per-core
    # block stays sublane-legal; 1-TC chips just run the axis sequentially.
    p_shards = 2 if (rows % (2 * min_sub) == 0) else 1
    rows_s = rows // p_shards

    if d_row < _LANE:
        width = d_row
        gpc = 1
    else:
        width_target = max(_LANE,
                           min(1024, (_LOCAL_ELEMS // rows_s) // _LANE * _LANE))
        width = min(width_target, (d_row // _LANE) * _LANE)
        gpc = max(1, min(_MAX_GROUPS, ((d_row // _LANE) * _LANE) // width))
    chunk = gpc * width
    n_chunks = -(-d_row // chunk)
    needs_mask = (d_row % chunk) != 0
    out_lanes = min(width, _LANE)

    kernel = _make_kernel(gpc, width, rows_s, chunk, d_row, out_lanes,
                          needs_mask)

    in_block_bytes = rows_s * chunk * (pred2.dtype.itemsize
                                       + target2.dtype.itemsize)
    vmem_need = 2 * in_block_bytes + 4 * rows * out_lanes * 4 + (6 << 20)
    vmem_limit = int(min(max(vmem_need, 32 << 20), 48 << 20))

    out = pl.pallas_call(
        kernel,
        out_shape=jax.ShapeDtypeStruct((2, rows, out_lanes), jnp.float32),
        grid_spec=pltpu.PrefetchScalarGridSpec(
            num_scalar_prefetch=0,
            grid=(p_shards, n_chunks),
            in_specs=[
                pl.BlockSpec((rows_s, chunk), lambda p, k: (p, k)),
                pl.BlockSpec((rows_s, chunk), lambda p, k: (p, k)),
            ],
            out_specs=pl.BlockSpec((2, rows_s, out_lanes),
                                   lambda p, k: (0, p, 0)),
            scratch_shapes=[
                pltpu.VMEM((rows_s, out_lanes), jnp.float32),  # sum(p * t)
                pltpu.VMEM((rows_s, out_lanes), jnp.float32),  # sum(p)+sum(t)
            ],
        ),
        compiler_params=pltpu.CompilerParams(
            dimension_semantics=("parallel", "arbitrary"),
            vmem_limit_bytes=vmem_limit,
        ),
    )(pred2, target2)

    # Tiny trailing fold: per-row 128-lane partials -> per-sample sums -> loss.
    inter = out[0].reshape(n, r * out_lanes).sum(axis=1)
    s12 = out[1].reshape(n, r * out_lanes).sum(axis=1)
    score = 2.0 * (inter + 1.0) / (s12 + 1.0)
    return (1.0 - jnp.sum(score) / n).astype(jnp.float32)


soft_dice_loss = jax.jit(_soft_dice_loss_impl)


def soft_dice_loss_ref(pred, target):
    n = pred.shape[0]
    m1 = jax.nn.sigmoid(pred.astype(jnp.float32)).reshape(n, -1)
    m2 = target.astype(jnp.float32).reshape(n, -1)
    inter = (m1 * m2).sum(1)
    score = 2.0 * (inter + 1.0) / (m1.sum(1) + m2.sum(1) + 1.0)
    return 1.0 - score.sum() / n


if __name__ == "__main__":
    key = jax.random.PRNGKey(0)
    k1, k2, k3, k4 = jax.random.split(key, 4)

    # Main check: small NCHW logits / binary mask pair, f32.
    pred = jax.random.normal(k1, (2, 4, 16, 16), dtype=jnp.float32)
    target = (jax.random.uniform(k2, (2, 4, 16, 16)) > 0.5).astype(jnp.float32)
    loss = jax.block_until_ready(soft_dice_loss(pred, target))
    ref = soft_dice_loss_ref(pred, target)
    assert jnp.allclose(loss, ref, atol=1e-5, rtol=1e-5), (loss, ref)

    # Ragged feature size (not lane-aligned): exercises the in-kernel tail
    # mask instead of any wrapper-side padding.
    pred_r = jax.random.normal(k3, (2, 3, 10, 10), dtype=jnp.float32)
    target_r = (jax.random.uniform(k4, (2, 3, 10, 10)) > 0.5).astype(jnp.float32)
    loss_r = jax.block_until_ready(soft_dice_loss(pred_r, target_r))
    ref_r = soft_dice_loss_ref(pred_r, target_r)
    assert jnp.allclose(loss_r, ref_r, atol=1e-5, rtol=1e-5), (loss_r, ref_r)

    # Narrow-dtype input path: bf16 logits fed straight to the kernel
    # (upcast to f32 inside the kernel; no wrapper cast / HBM round trip).
    loss_b = jax.block_until_ready(
        soft_dice_loss(pred.astype(jnp.bfloat16), target))
    ref_b = soft_dice_loss_ref(pred.astype(jnp.bfloat16), target)
    assert jnp.allclose(loss_b, ref_b, atol=1e-3, rtol=1e-3), (loss_b, ref_b)

    print("KERNEL_OK")
</pallas_src>

<mosaic_0001>
module attributes {stable_mosaic.version = 11 : i64} {
  func.func @kernel(%arg0: i32, %arg1: i32, %arg2: memref<8x128xf32, #tpu.memory_space<vmem>>, %arg3: memref<8x128xf32, #tpu.memory_space<vmem>>, %arg4: memref<2x8x128xf32, #tpu.memory_space<vmem>>, %arg5: memref<8x128xf32, #tpu.memory_space<vmem>>, %arg6: memref<8x128xf32, #tpu.memory_space<vmem>>) attributes {dimension_semantics = [#tpu.dimension_semantics<parallel>, #tpu.dimension_semantics<arbitrary>], iteration_bounds = array<i64: 2, 1>, scalar_prefetch = 0 : i64, scratch_operands = 2 : i64, tpu.core_type = #tpu.core_type<tc>, window_params = [{transform_indices = @transform_0, window_bounds = array<i64: 8, 128>}, {transform_indices = @transform_1, window_bounds = array<i64: 8, 128>}, {transform_indices = @transform_2, window_bounds = array<i64: 2, 8, 128>}]} {
    %c0_i32 = arith.constant 0 : i32
    %0 = arith.cmpi eq, %arg1, %c0_i32 : i32
    %1 = arith.extui %0 : i1 to i32
    %c0_i32_0 = arith.constant 0 : i32
    %2 = arith.cmpi ne, %1, %c0_i32_0 : i32
    scf.if %2 {
      %cst_18 = arith.constant 0.000000e+00 : f32
      %27 = vector.broadcast %cst_18 : f32 to vector<8x128xf32>
      %c0_19 = arith.constant 0 : index
      %c0_20 = arith.constant 0 : index
      %28 = vector.load %arg5[%c0_19, %c0_20] : memref<8x128xf32, #tpu.memory_space<vmem>>, vector<8x128xf32>
      tpu.vector_store %arg5[%c0_19, %c0_20], %27 {strides = array<i32>} : memref<8x128xf32, #tpu.memory_space<vmem>>, vector<8x128xf32>,
      %cst_21 = arith.constant 0.000000e+00 : f32
      %29 = vector.broadcast %cst_21 : f32 to vector<8x128xf32>
      %c0_22 = arith.constant 0 : index
      %c0_23 = arith.constant 0 : index
      %30 = vector.load %arg6[%c0_22, %c0_23] : memref<8x128xf32, #tpu.memory_space<vmem>>, vector<8x128xf32>
      tpu.vector_store %arg6[%c0_22, %c0_23], %29 {strides = array<i32>} : memref<8x128xf32, #tpu.memory_space<vmem>>, vector<8x128xf32>,
    } else {
    }
    %cst = arith.constant 0.000000e+00 : f32
    %3 = vector.broadcast %cst : f32 to vector<8x128xf32>
    %cst_1 = arith.constant 0.000000e+00 : f32
    %4 = vector.broadcast %cst_1 : f32 to vector<8x128xf32>
    %c0 = arith.constant 0 : index
    %c0_2 = arith.constant 0 : index
    %5 = vector.load %arg2[%c0, %c0_2] : memref<8x128xf32, #tpu.memory_space<vmem>>, vector<8x128xf32>
    %c0_3 = arith.constant 0 : index
    %c0_4 = arith.constant 0 : index
    %6 = vector.load %arg3[%c0_3, %c0_4] : memref<8x128xf32, #tpu.memory_space<vmem>>, vector<8x128xf32>
    %cst_5 = arith.constant 5.000000e-01 : f32
    %7 = vector.broadcast %cst_5 : f32 to vector<8x128xf32>
    %8 = arith.mulf %7, %5 : vector<8x128xf32>
    %9 = math.tanh %8 : vector<8x128xf32>
    %cst_6 = arith.constant 5.000000e-01 : f32
    %10 = vector.broadcast %cst_6 : f32 to vector<8x128xf32>
    %11 = arith.mulf %10, %9 : vector<8x128xf32>
    %cst_7 = arith.constant 5.000000e-01 : f32
    %12 = vector.broadcast %cst_7 : f32 to vector<8x128xf32>
    %13 = arith.addf %11, %12 : vector<8x128xf32>
    %14 = arith.mulf %13, %6 : vector<8x128xf32>
    %15 = arith.addf %3, %14 : vector<8x128xf32>
    %16 = arith.addf %13, %6 : vector<8x128xf32>
    %17 = arith.addf %4, %16 : vector<8x128xf32>
    %c0_8 = arith.constant 0 : index
    %c0_9 = arith.constant 0 : index
    %18 = vector.load %arg5[%c0_8, %c0_9] : memref<8x128xf32, #tpu.memory_space<vmem>>, vector<8x128xf32>
    %19 = arith.addf %18, %15 : vector<8x128xf32>
    %c0_10 = arith.constant 0 : index
    %c0_11 = arith.constant 0 : index
    %20 = vector.load %arg5[%c0_10, %c0_11] : memref<8x128xf32, #tpu.memory_space<vmem>>, vector<8x128xf32>
    tpu.vector_store %arg5[%c0_10, %c0_11], %19 {strides = array<i32>} : memref<8x128xf32, #tpu.memory_space<vmem>>, vector<8x128xf32>,
    %c0_12 = arith.constant 0 : index
    %c0_13 = arith.constant 0 : index
    %21 = vector.load %arg6[%c0_12, %c0_13] : memref<8x128xf32, #tpu.memory_space<vmem>>, vector<8x128xf32>
    %22 = arith.addf %21, %17 : vector<8x128xf32>
    %c0_14 = arith.constant 0 : index
    %c0_15 = arith.constant 0 : index
    %23 = vector.load %arg6[%c0_14, %c0_15] : memref<8x128xf32, #tpu.memory_space<vmem>>, vector<8x128xf32>
    tpu.vector_store %arg6[%c0_14, %c0_15], %22 {strides = array<i32>} : memref<8x128xf32, #tpu.memory_space<vmem>>, vector<8x128xf32>,
    %c0_i32_16 = arith.constant 0 : i32
    %24 = arith.cmpi eq, %arg1, %c0_i32_16 : i32
    %25 = arith.extui %24 : i1 to i32
    %c0_i32_17 = arith.constant 0 : i32
    %26 = arith.cmpi ne, %25, %c0_i32_17 : i32
    scf.if %26 {
      %c0_18 = arith.constant 0 : index
      %c0_19 = arith.constant 0 : index
      %27 = vector.load %arg5[%c0_18, %c0_19] : memref<8x128xf32, #tpu.memory_space<vmem>>, vector<8x128xf32>
      %c0_20 = arith.constant 0 : index
      %c0_21 = arith.constant 0 : index
      %c0_22 = arith.constant 0 : index
      %28 = vector.load %arg4[%c0_20, %c0_21, %c0_22] : memref<2x8x128xf32, #tpu.memory_space<vmem>>, vector<1x8x128xf32>
      %29 = vector.shape_cast %28 : vector<1x8x128xf32> to vector<8x128xf32>
      %30 = vector.shape_cast %27 : vector<8x128xf32> to vector<1x8x128xf32>
      tpu.vector_store %arg4[%c0_20, %c0_21, %c0_22], %30 {strides = array<i32>} : memref<2x8x128xf32, #tpu.memory_space<vmem>>, vector<1x8x128xf32>,
      %c0_23 = arith.constant 0 : index
      %c0_24 = arith.constant 0 : index
      %31 = vector.load %arg6[%c0_23, %c0_24] : memref<8x128xf32, #tpu.memory_space<vmem>>, vector<8x128xf32>
      %c1 = arith.constant 1 : index
      %c0_25 = arith.constant 0 : index
      %c0_26 = arith.constant 0 : index
      %32 = vector.load %arg4[%c1, %c0_25, %c0_26] : memref<2x8x128xf32, #tpu.memory_space<vmem>>, vector<1x8x128xf32>
      %33 = vector.shape_cast %32 : vector<1x8x128xf32> to vector<8x128xf32>
      %34 = vector.shape_cast %31 : vector<8x128xf32> to vector<1x8x128xf32>
      tpu.vector_store %arg4[%c1, %c0_25, %c0_26], %34 {strides = array<i32>} : memref<2x8x128xf32, #tpu.memory_space<vmem>>, vector<1x8x128xf32>,
    } else {
    }
    return
  }
  func.func @transform_0(%arg0: i32, %arg1: i32) -> (i32, i32) {
    %c0_i32 = arith.constant 0 : i32
    return %arg0, %arg1 : i32, i32
  }
  func.func @transform_1(%arg0: i32, %arg1: i32) -> (i32, i32) {
    %c0_i32 = arith.constant 0 : i32
    return %arg0, %arg1 : i32, i32
  }
  func.func @transform_2(%arg0: i32, %arg1: i32) -> (i32, i32, i32) {
    %c0_i32 = arith.constant 0 : i32
    %c0_i32_0 = arith.constant 0 : i32
    %c0_i32_1 = arith.constant 0 : i32
    return %c0_i32, %arg0, %c0_i32_0 : i32, i32, i32
  }
}

</mosaic_0001>

<bundles_post_ra>
// kernel: _soft_dice_loss_impl.1
= control target key start
LH: loop header
LB: loop body
LE: loop exit
PB: predicated region body
PF: predicated region fallthrough
CT: control target
= control target key end

     0   :  { %s448_s9 = smov 0   ;;  %s450_s10 = smov 0   ;;  %s521_s0 = inlined_call_operand.vmem [shape: f32[16,128], index: 0, kind: input, shape index: {}]   ;;  %s522_s1 = inlined_call_operand.vmem [shape: f32[16,128], index: 1, kind: input, shape index: {}]   ;;  %s523_s2 = inlined_call_operand.vmem [shape: f32[2,16,128], index: 2, kind: output, shape index: {}]  }
   0x1   :  { %s452_s11 = smov 0   ;;  %s454_s12 = smov 0  }
   0x2   :  { %s456_s13 = smov 0  }
   0x3 LB: > { %s338_s14 = sadd.s32 4294967295, %s431_s13   ;;  %s24_s15 = sadd.s32 1, %s427_s12  ;;  %s431_s13 = sphi %s456_s13, %s12_s13   ;;  %s427_s12 = sphi %s454_s12, %s528_s12   ;;  %s423_s11 = sphi %s452_s11, %s527_s11   ;;  %s419_s10 = sphi %s450_s10, %s526_s10   ;;  %s415_s9 = sphi %s448_s9, %s525_s9  }
   0x4   : > { %p26_p0 = scmp.ge.s32.totalorder %s24_s15, 2  ;;  %s87_s16 = sadd.s32 1, %s419_s10 }
   0x5   : > { %p97_p1 = scmp.ne.s32.totalorder %s419_s10, %s415_s9  ;;  %p98_p2 = scmp.eq.s32.totalorder %s338_s14, 1 }
   0x6   : > { %s530_s15 = smov (%p26_p0, %s24_s15), 0  ;;  %p342_p4 = scmp.ge.s32.totalorder %s431_s13, 1 }
   0x7   : > { %p480_p3 = por %p98_p2, %p97_p1  ;;  %s84_s18 = ssub.s32 %s427_s12, %s530_s15 }
   0x8   : > { %p142_p5 = scmp.lt.s32.totalorder %s431_s13, 3  ;;  %p85_p6 = scmp.eq.s32.totalorder %s84_s18, 0 }
   0xa   : > { %p143_p7 = pnand %p342_p4, %p142_p5 }
   0xb   : > { %s489_s19 = scalar_select %p85_p6, %s419_s10, %s87_s16  }
   0xc   : > { %146 = sbr.rel (%p143_p7) target bundleno = 52 (0x34), region = 28  ;;  %p172_p8 = scmp.lt.s32.totalorder (!%p143_p7), %s423_s11, 1 }
   0xd   : > { %s169_s25 = sand.u32 (!%p143_p7), 1, %s415_s9  }
   0xe   : > { %s343_s29 = sshll.u32 (!%p143_p7), %s169_s25, 4 }
   0xf   : > { %s171_s30 = scalar_lea.vmem (!%p143_p7), [#allocation4], %s343_s29 }
  0x13   : > { %s173_s20 = scalar_select %p172_p8, %s423_s11, 1 }
  0x14   : > { %s348_s3 = sshll.u32 (%p480_p3), %s423_s11, 3 }
  0x15   : > { %s344_s21 = sshll.u32 %s173_s20, 3  ;;  %s224_s6 = scalar_lea.vmem (%p480_p3), %s523_s2, %s348_s3 }
  0x16   : > { %s178_s24 = scalar_lea.vmem %s521_s0, %s344_s21  ;;  %s185_s28 = scalar_lea.vmem %s522_s1, %s344_s21 }
  0x17   : > { %v192_v0 = vld [vmem:[%s178_s24] sm:$0xff] }
  0x18   : > { %v194_v1 = vmul.f32 0.5, %v192_v0  ;;  %v193_v4 = vld [vmem:[%s185_s28] sm:$0xff] }
  0x1a   : > { %391 = vtanh.f32 %v194_v1 }
  0x24   : > { %v392_v2 = vpop.eup %391 }
  0x25   : > { %v196_v3 = vmul.f32 0.5, %v392_v2  ;;  %222 = sbr.rel (!%p480_p3) target bundleno = 52 (0x34), region = 40 }
  0x27   : > { %v197_v5 = vadd.f32 0.5, %v196_v3 }
  0x29   : > { %v198_v6 = vmul.f32 %v197_v5, %v193_v4  ;;  %v200_v7 = vadd.f32 %v197_v5, %v193_v4 }
  0x2b   : > { %212 = vst [vmem:[%s171_s30] sm:$0xff] %v198_v6  ;;  %346 = vst [vmem:[%s171_s30 + $0x8] sm:$0xff] %v200_v7 }
  0x32   : > { %v254_v8 = vld [vmem:[%s171_s30] sm:$0xff]  ;;  %v256_v9 = vld [vmem:[%s171_s30 + $0x8] sm:$0xff] }
  0x33   : > { %255 = vst [vmem:[%s224_s6] sm:$0xff] %v254_v8  ;;  %257 = vst [vmem:[%s224_s6 + $0x10] sm:$0xff] %v256_v9 }
  0x34 PF: > { %s12_s13 = sadd.s32 1, %s431_s13   ;;  %s525_s9 = smov %s419_s10 }
  0x35   : > { %p9_p9 = scmp.ge.s32.totalorder %s12_s13, 4   ;;  %s526_s10 = smov %s489_s19 }
  0x36   : > { %s527_s11 = smov %s427_s12  ;;  %s528_s12 = smov %s530_s15 }
  0x37   :  { %11 = sbr.rel (!%p9_p9) target bundleno = 3 (0x3), region = 108 }

</bundles_post_ra>
